<compile_context>
chip_gen: v5e
topology: v5e:2x2
jax: 0.10.0
libtpu: 0.0.40
codegen_flags: <defaults>
</compile_context>

<pallas_src>
import functools

import jax
import jax.numpy as jnp
from jax.experimental import pallas as pl
from jax.experimental.pallas import tpu as pltpu

_LANE = 128


def _round_up(x, m):
    return ((x + m - 1) // m) * m


def _mlp_kernel(x_ref, w1_ref, b1_ref, w2_ref, b2_ref, w3_ref, b3_ref, o_ref):
    # Feature-major tiles:
    #   x_ref : (in_dim, bm)      w1 : (Hp, in_dim)   b1 : (Hp, 1)
    #   w2    : (Hp, Hp)          b2 : (Hp, 1)
    #   w3    : (out_dim, Hp)     b3 : (out_dim, 1)
    #   o_ref : (out_dim, bm)
    x = x_ref[...]
    w1 = w1_ref[...]
    in_dim = x.shape[0]

    # ---- fc1 on the VPU: K=in_dim(=2) contraction as broadcast FMAs --------
    # w1 columns broadcast across lanes (loop/grid invariant); x rows
    # broadcast across sublanes (cheap direction).
    h1 = b1_ref[...] + w1[:, 0:1] * x[0:1, :]
    for k in range(1, in_dim):  # static, tiny loop (in_dim == 2)
        h1 = h1 + w1[:, k : k + 1] * x[k : k + 1, :]
    h1 = jnp.maximum(h1, 0.0)

    # ---- fc2 on the MXU (the only "real" matmul, stationary (Hp,Hp) LHS) ---
    h2 = jnp.dot(w2_ref[...], h1, preferred_element_type=jnp.float32)
    h2 = jnp.maximum(h2 + b2_ref[...], 0.0)

    # ---- fc3: single small (M=out_dim) MXU pass -----------------------------
    out = jnp.dot(w3_ref[...], h2, preferred_element_type=jnp.float32)
    out = out + b3_ref[...]

    o_ref[...] = out.astype(o_ref.dtype)


def prepare_params(w1, b1, w2, b2, w3, b3):
    """One-time parameter prep (call once, outside the hot path).

    Takes math-layout params (w: (in, out), b: (out,)) and returns
    feature-major, hidden-dim-padded params:
      w1t (Hp, in), b1t (Hp, 1), w2t (Hp, Hp), b2t (Hp, 1),
      w3t (out, Hp), b3t (out, 1)   with Hp a multiple of 128.
    Zero padding is inert through bias/ReLU/matmuls.
    """
    H = w1.shape[1]
    Hp = _round_up(max(H, _LANE), _LANE)
    ph = Hp - H
    w1t = jnp.pad(jnp.asarray(w1, jnp.float32).T, ((0, ph), (0, 0)))
    b1t = jnp.pad(jnp.asarray(b1, jnp.float32).reshape(-1, 1), ((0, ph), (0, 0)))
    w2t = jnp.pad(jnp.asarray(w2, jnp.float32).T, ((0, ph), (0, ph)))
    b2t = jnp.pad(jnp.asarray(b2, jnp.float32).reshape(-1, 1), ((0, ph), (0, 0)))
    w3t = jnp.pad(jnp.asarray(w3, jnp.float32).T, ((0, 0), (0, ph)))
    b3t = jnp.asarray(b3, jnp.float32).reshape(-1, 1)
    return w1t, b1t, w2t, b2t, w3t, b3t


@functools.partial(jax.jit, static_argnames=("block_m",))
def net_forward(x, w1t, b1t, w2t, b2t, w3t, b3t, *, block_m=4096):
    """Fused MLP forward. x: (B, 2) float32 -> (B, 2) float32.

    Params must come from `prepare_params` (feature-major, padded hidden dim).
    """
    B, in_dim = x.shape
    Hp = w2t.shape[0]
    out_dim = w3t.shape[0]

    # --- pick the batch tile (batch lives on the lane axis) ------------------
    # * multiple of 128 (lane-dense), capped by block_m
    # * >= 2 grid steps when the batch allows it (megacore on v7x)
    # * steps balanced to minimize padded (wasted) work
    bm_cap = max(_LANE, _round_up(min(block_m, B), _LANE))
    n_steps = pl.cdiv(B, bm_cap)
    if B > _LANE:
        n_steps = max(n_steps, 2)
    bm = _round_up(pl.cdiv(B, n_steps), _LANE)
    Bp = _round_up(B, bm)

    # Feature-major input slab; pad batch (lane axis) so the grid divides.
    # TODO(synk): for very large ragged batches, mask the final block's store
    # instead of padding to avoid the extra pad/slice pass over x.
    xt = x.T  # (in_dim, B)
    if Bp != B:
        xt = jnp.pad(xt, ((0, 0), (0, Bp - B)))

    grid = (Bp // bm,)

    # Weights/biases are tiny: constant index maps keep them VMEM-resident.
    const = lambda shape: pl.BlockSpec(shape, lambda i: (0,) * len(shape))

    out_t = pl.pallas_call(
        _mlp_kernel,
        out_shape=jax.ShapeDtypeStruct((out_dim, Bp), jnp.float32),
        grid_spec=pl.GridSpec(
            grid=grid,
            in_specs=[
                pl.BlockSpec((in_dim, bm), lambda i: (0, i)),  # x^T tile
                const((Hp, in_dim)),   # w1t
                const((Hp, 1)),        # b1t
                const((Hp, Hp)),       # w2t
                const((Hp, 1)),        # b2t
                const((out_dim, Hp)),  # w3t
                const((out_dim, 1)),   # b3t
            ],
            out_specs=pl.BlockSpec((out_dim, bm), lambda i: (0, i)),
        ),
        compiler_params=pltpu.CompilerParams(
            dimension_semantics=("parallel",),
            vmem_limit_bytes=32 * 1024 * 1024,  # safe on v5e/v6e/v7x
        ),
    )(xt, w1t, b1t, w2t, b2t, w3t, b3t)

    return out_t[:, :B].T


def init_params(key, hidden_size=64, in_dim=2, out_dim=2):
    """Deterministic init mimicking nn.Linear's U(-1/sqrt(fan_in), 1/sqrt(fan_in))."""
    ks = jax.random.split(key, 6)

    def linear(kw, kb, fan_in, fan_out):
        bound = 1.0 / jnp.sqrt(jnp.float32(fan_in))
        # math layout: (in, out) = transpose of PyTorch's (out, in) weight
        w = jax.random.uniform(kw, (fan_in, fan_out), jnp.float32, -bound, bound)
        b = jax.random.uniform(kb, (fan_out,), jnp.float32, -bound, bound)
        return w, b

    w1, b1 = linear(ks[0], ks[1], in_dim, hidden_size)
    w2, b2 = linear(ks[2], ks[3], hidden_size, hidden_size)
    w3, b3 = linear(ks[4], ks[5], hidden_size, out_dim)
    return w1, b1, w2, b2, w3, b3


def _reference(x, w1, b1, w2, b2, w3, b3):
    h1 = jnp.maximum(x @ w1 + b1, 0.0)
    h2 = jnp.maximum(h1 @ w2 + b2, 0.0)
    return h2 @ w3 + b3


if __name__ == "__main__":
    key = jax.random.PRNGKey(0)
    k_params, k_x1, k_x2 = jax.random.split(key, 3)

    hidden = 64
    raw_params = init_params(k_params, hidden_size=hidden)
    params = prepare_params(*raw_params)  # one-time prep, outside hot path

    # Small batch: single-step grid path.
    x = jax.random.normal(k_x1, (8, 2), jnp.float32)
    out = jax.block_until_ready(net_forward(x, *params))
    ref = _reference(x, *raw_params)
    assert out.shape == (8, 2)
    assert jnp.allclose(out, ref, atol=1e-5, rtol=1e-5)

    # Ragged batch: exercises the pad path and a >=2-step (megacore) grid.
    x2 = jax.random.normal(k_x2, (300, 2), jnp.float32)
    out2 = jax.block_until_ready(net_forward(x2, *params))
    ref2 = _reference(x2, *raw_params)
    assert out2.shape == (300, 2)
    assert jnp.allclose(out2, ref2, atol=1e-5, rtol=1e-5)

    print("KERNEL_OK")
</pallas_src>

<mosaic_0001>
module attributes {stable_mosaic.version = 11 : i64} {
  func.func @_mlp_kernel(%arg0: i32, %arg1: memref<2x128xf32, #tpu.memory_space<vmem>>, %arg2: memref<128x2xf32, #tpu.memory_space<vmem>>, %arg3: memref<128x1xf32, #tpu.memory_space<vmem>>, %arg4: memref<128x128xf32, #tpu.memory_space<vmem>>, %arg5: memref<128x1xf32, #tpu.memory_space<vmem>>, %arg6: memref<2x128xf32, #tpu.memory_space<vmem>>, %arg7: memref<2x1xf32, #tpu.memory_space<vmem>>, %arg8: memref<2x128xf32, #tpu.memory_space<vmem>>) attributes {dimension_semantics = [#tpu.dimension_semantics<parallel>], iteration_bounds = array<i64: 1>, scalar_prefetch = 0 : i64, scratch_operands = 0 : i64, tpu.core_type = #tpu.core_type<tc>, window_params = [{transform_indices = @transform_0, window_bounds = array<i64: 2, 128>}, {pipeline_mode = #tpu.pipeline_mode<synchronous>, transform_indices = @transform_1, window_bounds = array<i64: 128, 2>}, {pipeline_mode = #tpu.pipeline_mode<synchronous>, transform_indices = @transform_2, window_bounds = array<i64: 128, 1>}, {pipeline_mode = #tpu.pipeline_mode<synchronous>, transform_indices = @transform_3, window_bounds = array<i64: 128, 128>}, {pipeline_mode = #tpu.pipeline_mode<synchronous>, transform_indices = @transform_4, window_bounds = array<i64: 128, 1>}, {pipeline_mode = #tpu.pipeline_mode<synchronous>, transform_indices = @transform_5, window_bounds = array<i64: 2, 128>}, {pipeline_mode = #tpu.pipeline_mode<synchronous>, transform_indices = @transform_6, window_bounds = array<i64: 2, 1>}, {transform_indices = @transform_7, window_bounds = array<i64: 2, 128>}]} {
    %c0 = arith.constant 0 : index
    %c0_0 = arith.constant 0 : index
    %0 = vector.load %arg1[%c0, %c0_0] : memref<2x128xf32, #tpu.memory_space<vmem>>, vector<2x128xf32>
    %c0_1 = arith.constant 0 : index
    %c0_2 = arith.constant 0 : index
    %1 = vector.load %arg2[%c0_1, %c0_2] : memref<128x2xf32, #tpu.memory_space<vmem>>, vector<128x2xf32>
    %c0_3 = arith.constant 0 : index
    %c0_4 = arith.constant 0 : index
    %2 = vector.load %arg3[%c0_3, %c0_4] : memref<128x1xf32, #tpu.memory_space<vmem>>, vector<128x1xf32>
    %3 = vector.extract_strided_slice %1 {offsets = [0, 0], sizes = [128, 1], strides = [1, 1]} : vector<128x2xf32> to vector<128x1xf32>
    %4 = vector.extract_strided_slice %0 {offsets = [0, 0], sizes = [1, 128], strides = [1, 1]} : vector<2x128xf32> to vector<1x128xf32>
    %5 = vector.broadcast %3 : vector<128x1xf32> to vector<128x128xf32>
    %6 = vector.broadcast %4 : vector<1x128xf32> to vector<128x128xf32>
    %7 = arith.mulf %5, %6 : vector<128x128xf32>
    %8 = vector.broadcast %2 : vector<128x1xf32> to vector<128x128xf32>
    %9 = arith.addf %8, %7 : vector<128x128xf32>
    %10 = vector.extract_strided_slice %1 {offsets = [0, 1], sizes = [128, 1], strides = [1, 1]} : vector<128x2xf32> to vector<128x1xf32>
    %11 = vector.extract_strided_slice %0 {offsets = [1, 0], sizes = [1, 128], strides = [1, 1]} : vector<2x128xf32> to vector<1x128xf32>
    %12 = vector.broadcast %10 : vector<128x1xf32> to vector<128x128xf32>
    %13 = vector.broadcast %11 : vector<1x128xf32> to vector<128x128xf32>
    %14 = arith.mulf %12, %13 : vector<128x128xf32>
    %15 = arith.addf %9, %14 : vector<128x128xf32>
    %cst = arith.constant 0.000000e+00 : f32
    %16 = vector.broadcast %cst : f32 to vector<128x128xf32>
    %17 = arith.maximumf %15, %16 : vector<128x128xf32>
    %c0_5 = arith.constant 0 : index
    %c0_6 = arith.constant 0 : index
    %18 = vector.load %arg4[%c0_5, %c0_6] : memref<128x128xf32, #tpu.memory_space<vmem>>, vector<128x128xf32>
    %cst_7 = arith.constant dense<0.000000e+00> : vector<128x128xf32>
    %19 = tpu.matmul %18, %17, %cst_7 {dimension_numbers = #tpu.dot_dimension_numbers<[1], [0], [0], [1], [0, 0, 1, 1], [], []>} : vector<128x128xf32>, vector<128x128xf32>, vector<128x128xf32> -> vector<128x128xf32>
    %c0_8 = arith.constant 0 : index
    %c0_9 = arith.constant 0 : index
    %20 = vector.load %arg5[%c0_8, %c0_9] : memref<128x1xf32, #tpu.memory_space<vmem>>, vector<128x1xf32>
    %21 = vector.broadcast %20 : vector<128x1xf32> to vector<128x128xf32>
    %22 = arith.addf %19, %21 : vector<128x128xf32>
    %cst_10 = arith.constant 0.000000e+00 : f32
    %23 = vector.broadcast %cst_10 : f32 to vector<128x128xf32>
    %24 = arith.maximumf %22, %23 : vector<128x128xf32>
    %c0_11 = arith.constant 0 : index
    %c0_12 = arith.constant 0 : index
    %25 = vector.load %arg6[%c0_11, %c0_12] : memref<2x128xf32, #tpu.memory_space<vmem>>, vector<2x128xf32>
    %cst_13 = arith.constant dense<0.000000e+00> : vector<2x128xf32>
    %26 = tpu.matmul %25, %24, %cst_13 {dimension_numbers = #tpu.dot_dimension_numbers<[1], [0], [0], [1], [0, 0, 1, 1], [], []>} : vector<2x128xf32>, vector<128x128xf32>, vector<2x128xf32> -> vector<2x128xf32>
    %c0_14 = arith.constant 0 : index
    %c0_15 = arith.constant 0 : index
    %27 = vector.load %arg7[%c0_14, %c0_15] : memref<2x1xf32, #tpu.memory_space<vmem>>, vector<2x1xf32>
    %28 = vector.broadcast %27 : vector<2x1xf32> to vector<2x128xf32>
    %29 = arith.addf %26, %28 : vector<2x128xf32>
    %c0_16 = arith.constant 0 : index
    %c0_17 = arith.constant 0 : index
    %30 = vector.load %arg8[%c0_16, %c0_17] : memref<2x128xf32, #tpu.memory_space<vmem>>, vector<2x128xf32>
    tpu.vector_store %arg8[%c0_16, %c0_17], %29 {strides = array<i32>} : memref<2x128xf32, #tpu.memory_space<vmem>>, vector<2x128xf32>,
    return
  }
  func.func @transform_0(%arg0: i32) -> (i32, i32) {
    %c0_i32 = arith.constant 0 : i32
    %c0_i32_0 = arith.constant 0 : i32
    return %c0_i32, %arg0 : i32, i32
  }
  func.func @transform_1(%arg0: i32) -> (i32, i32) {
    %c0_i32 = arith.constant 0 : i32
    %c0_i32_0 = arith.constant 0 : i32
    %c0_i32_1 = arith.constant 0 : i32
    return %c0_i32, %c0_i32_0 : i32, i32
  }
  func.func @transform_2(%arg0: i32) -> (i32, i32) {
    %c0_i32 = arith.constant 0 : i32
    %c0_i32_0 = arith.constant 0 : i32
    %c0_i32_1 = arith.constant 0 : i32
    return %c0_i32, %c0_i32_0 : i32, i32
  }
  func.func @transform_3(%arg0: i32) -> (i32, i32) {
    %c0_i32 = arith.constant 0 : i32
    %c0_i32_0 = arith.constant 0 : i32
    %c0_i32_1 = arith.constant 0 : i32
    return %c0_i32, %c0_i32_0 : i32, i32
  }
  func.func @transform_4(%arg0: i32) -> (i32, i32) {
    %c0_i32 = arith.constant 0 : i32
    %c0_i32_0 = arith.constant 0 : i32
    %c0_i32_1 = arith.constant 0 : i32
    return %c0_i32, %c0_i32_0 : i32, i32
  }
  func.func @transform_5(%arg0: i32) -> (i32, i32) {
    %c0_i32 = arith.constant 0 : i32
    %c0_i32_0 = arith.constant 0 : i32
    %c0_i32_1 = arith.constant 0 : i32
    return %c0_i32, %c0_i32_0 : i32, i32
  }
  func.func @transform_6(%arg0: i32) -> (i32, i32) {
    %c0_i32 = arith.constant 0 : i32
    %c0_i32_0 = arith.constant 0 : i32
    %c0_i32_1 = arith.constant 0 : i32
    return %c0_i32, %c0_i32_0 : i32, i32
  }
  func.func @transform_7(%arg0: i32) -> (i32, i32) {
    %c0_i32 = arith.constant 0 : i32
    %c0_i32_0 = arith.constant 0 : i32
    return %c0_i32, %arg0 : i32, i32
  }
}

</mosaic_0001>

<bundles_post_ra>
// kernel: net_forward.1
= control target key start
LH: loop header
LB: loop body
LE: loop exit
PB: predicated region body
PF: predicated region fallthrough
CT: control target
= control target key end

     0   :  { %v636_v0 = vmov 1   ;;  %v637_v1 = vmov 0   ;;  %s936_s2 = inlined_call_operand.vmem [shape: f32[128,1], index: 2, kind: input, shape index: {}]   ;;  %s937_s1 = inlined_call_operand.vmem [shape: f32[128,2], index: 1, kind: input, shape index: {}]   ;;  %s938_s0 = inlined_call_operand.vmem [shape: f32[2,128], index: 0, kind: input, shape index: {}]   ;;  %s939_s4 = inlined_call_operand.vmem [shape: f32[128,1], index: 4, kind: input, shape index: {}]   ;;  %s940_s6 = inlined_call_operand.vmem [shape: f32[2,1], index: 6, kind: input, shape index: {}]   ;;  %s941_s3 = inlined_call_operand.vmem [shape: f32[128,128], index: 3, kind: input, shape index: {}]   ;;  %s942_s5 = inlined_call_operand.vmem [shape: f32[2,128], index: 5, kind: input, shape index: {}]   ;;  %s943_s7 = inlined_call_operand.vmem [shape: f32[2,128], index: 7, kind: output, shape index: {}]  }
   0x1   :  { %627 = vset.pattern.permute.xlu0 %v636_v0  ;;  %626 = vset.pattern.permute.xlu2 %v637_v1  ;;  %v58_v2 = vld [vmem:[%s936_s2 + $0x78] sm:$0xff]  ;;  %v41_v3 = vld [vmem:[%s937_s1 + $0x70] sm:$0xff]  ;;  %v40_v4 = vld [vmem:[%s937_s1 + $0x68] sm:$0xff] }
   0x2   :  { %624 = vset.pattern.permute.xlu1 %v637_v1  ;;  %309 = vperm.xlu0 %627, %v41_v3   ;;  %v57_v5 = vld [vmem:[%s936_s2 + $0x70] sm:$0xff]  ;;  %v42_v6 = vld [vmem:[%s937_s1 + $0x78] sm:$0xff]  ;;  %v56_v7 = vld [vmem:[%s936_s2 + $0x68] sm:$0xff] }
   0x3   :  { %233 = vperm.xlu1 %624, %v58_v2   ;;  %126 = vperm.xlu2 %626, %v40_v4   ;;  %v39_v8 = vld [vmem:[%s937_s1 + $0x60] sm:$0xff]  ;;  %v38_v9 = vld [vmem:[%s937_s1 + $0x58] sm:$0xff]  ;;  %v37_v11 = vld [vmem:[%s937_s1 + $0x50] sm:$0xff] }
   0x4   :  { %v55_v10 = vld [vmem:[%s936_s2 + $0x60] sm:$0xff]  ;;  %v36_v12 = vld [vmem:[%s937_s1 + $0x48] sm:$0xff]  ;;  %v54_v14 = vld [vmem:[%s936_s2 + $0x58] sm:$0xff] }
   0x5   :  { %v35_v13 = vld [vmem:[%s937_s1 + $0x40] sm:$0xff]  ;;  %v34_v15 = vld [vmem:[%s937_s1 + $0x38] sm:$0xff]  ;;  %v53_v16 = vld [vmem:[%s936_s2 + $0x50] sm:$0xff] }
   0x6   :  { %v33_v17 = vld [vmem:[%s937_s1 + $0x30] sm:$0xff]  ;;  %v52_v18 = vld [vmem:[%s936_s2 + $0x48] sm:$0xff]  ;;  %v51_v20 = vld [vmem:[%s936_s2 + $0x40] sm:$0xff] }
   0x7   :  { %v32_v19 = vld [vmem:[%s937_s1 + $0x28] sm:$0xff]  ;;  %v31_v21 = vld [vmem:[%s937_s1 + $0x20] sm:$0xff]  ;;  %v50_v22 = vld [vmem:[%s936_s2 + $0x38] sm:$0xff] }
   0x8   :  { %v30_v23 = vld [vmem:[%s937_s1 + $0x18] sm:$0xff]  ;;  %v49_v24 = vld [vmem:[%s936_s2 + $0x30] sm:$0xff]  ;;  %v48_v26 = vld [vmem:[%s936_s2 + $0x28] sm:$0xff] }
   0x9   :  { %v29_v25 = vld [vmem:[%s937_s1 + $0x10] sm:$0xff]  ;;  %v28_v28 = vld [vmem:[%s937_s1 + $0x8] sm:$0xff]  ;;  %v47_v29 = vld [vmem:[%s936_s2 + $0x20] sm:$0xff] }
   0xa   :  { %628 = vset.pattern.permute.xlu0 %v637_v1  ;;  %v27_v31 = vld [vmem:[%s937_s1] sm:$0xff]  ;;  %v46_v32 = vld [vmem:[%s936_s2 + $0x18] sm:$0xff]  ;;  %v45_v36 = vld [vmem:[%s936_s2 + $0x10] sm:$0xff] }
   0xb   :  { %625 = vset.pattern.permute.xlu1 %v636_v0  ;;  %228 = vperm.xlu2 %626, %v57_v5   ;;  %v43_v34 = vld [vmem:[%s936_s2] sm:$0xff]  ;;  %v395_v40 = vld [vmem:[%s939_s4 + $0x70] sm:$0xff]  ;;  %v44_v42 = vld [vmem:[%s936_s2 + $0x8] sm:$0xff] }
   0xc   :  { %313 = vperm.xlu1 %625, %v42_v6   ;;  %136 = vperm.xlu0 %628, %v42_v6   ;;  %v26_v39 = vld [vmem:[%s938_s0] sm:$0x3]  ;;  %v392_v50 = vld [vmem:[%s939_s4 + $0x58] sm:$0xff] }
   0xd   :  { %v788_v41 = vperm.slane %v26_v39, 0  ;;  %v793_v43 = vperm.slane %v26_v39, 1  ;;  %v389_v58 = vld [vmem:[%s939_s4 + $0x40] sm:$0xff] }
  0x13   :  { %223 = vperm.xlu2 %626, %v56_v7  }
  0x14   :  { %629 = vset.pattern.permute.xlu1 %v637_v1  ;;  %131 = vperm.xlu0 %628, %v41_v3  }
  0x15   :  { %121 = vperm.xlu1 %629, %v39_v8  }
  0x1b   :  { %116 = vperm.xlu2 %626, %v38_v9  }
  0x1c   :  { %218 = vperm.xlu0 %628, %v55_v10  }
  0x1d   :  { %630 = vset.pattern.permute.xlu1 %v636_v0 }
  0x1e   :  { %305 = vperm.xlu1 %630, %v40_v4   ;;  %v386_v4 = vld [vmem:[%s939_s4 + $0x28] sm:$0xff] }
  0x23   :  { %111 = vperm.xlu2 %626, %v37_v11  }
  0x24   :  { %106 = vperm.xlu0 %628, %v36_v12  }
  0x26   :  { %301 = vperm.xlu1 %630, %v39_v8  }
  0x2b   :  { %632 = vset.pattern.permute.xlu2 %v636_v0 }
  0x2c   :  { %297 = vperm.xlu2 %632, %v38_v9   ;;  %101 = vperm.xlu0 %628, %v35_v13  }
  0x2e   :  { %631 = vset.pattern.permute.xlu1 %v637_v1 }
  0x2f   :  { %213 = vperm.xlu1 %631, %v54_v14  }
  0x34   :  { %293 = vperm.xlu2 %632, %v37_v11   ;;  %96 = vperm.xlu0 %628, %v34_v15  }
  0x37   :  { %208 = vperm.xlu1 %631, %v53_v16  }
  0x3c   :  { %289 = vperm.xlu2 %632, %v36_v12   ;;  %91 = vperm.xlu0 %628, %v33_v17  }
  0x3f   :  { %203 = vperm.xlu1 %631, %v52_v18  }
  0x44   :  { %285 = vperm.xlu2 %632, %v35_v13   ;;  %86 = vperm.xlu0 %628, %v32_v19   ;;  %v383_v13 = vld [vmem:[%s939_s4 + $0x10] sm:$0xff] }
  0x47   :  { %198 = vperm.xlu1 %631, %v51_v20   ;;  %v559_v20 = vld [vmem:[%s940_s6] sm:$0x3] }
  0x4c   :  { %281 = vperm.xlu2 %632, %v34_v15   ;;  %81 = vperm.xlu0 %628, %v31_v21  }
  0x4f   :  { %193 = vperm.xlu1 %631, %v50_v22  }
  0x54   :  { %277 = vperm.xlu2 %632, %v33_v17   ;;  %76 = vperm.xlu0 %628, %v30_v23  }
  0x57   :  { %188 = vperm.xlu1 %631, %v49_v24  }
  0x5c   :  { %273 = vperm.xlu2 %632, %v32_v19   ;;  %71 = vperm.xlu0 %628, %v29_v25  }
  0x5d   :  { %v127_v27 = vpop.permute.xlu2 %126 }
  0x5e   :  { %v153_v61 = vmul.f32 %v788_v41, %v127_v27 }
  0x5f   :  { %183 = vperm.xlu1 %631, %v48_v26  }
  0x64   :  { %269 = vperm.xlu2 %632, %v31_v21   ;;  %66 = vperm.xlu0 %628, %v28_v28  }
  0x65   :  { %v229_v30 = vpop.permute.xlu2 %228 }
  0x67   :  { %178 = vperm.xlu1 %631, %v47_v29  }
  0x6c   :  { %265 = vperm.xlu2 %632, %v30_v23   ;;  %61 = vperm.xlu0 %628, %v27_v31  }
  0x6d   :  { %v224_v33 = vpop.permute.xlu2 %223 }
  0x6e   :  { %v249_v2 = vadd.f32 %v224_v33, %v153_v61 }
  0x6f   :  { %173 = vperm.xlu1 %631, %v46_v32  }
  0x74   :  { %261 = vperm.xlu2 %632, %v29_v25   ;;  %158 = vperm.xlu0 %628, %v43_v34   ;;  %v310_v35 = vpop.permute.xlu0 %309 }
  0x75   :  { %v234_v37 = vpop.permute.xlu1 %233  ;;  %v780_v38 = vpop.permute.xlu2 %116  ;;  %v331_v54 = vmul.f32 %v793_v43, %v310_v35 }
  0x76   :  { %v151_v17 = vmul.f32 %v788_v41, %v780_v38 }
  0x77   :  { %168 = vperm.xlu1 %631, %v45_v36  }
  0x7c   :  { %257 = vperm.xlu2 %632, %v28_v28   ;;  %469 = vperm.xlu0 %628, %v395_v40  }
  0x7d   :  { %v796_v47 = vpop.permute.xlu2 %111 }
  0x7e   :  { %v314_v44 = vpop.permute.xlu1 %313  ;;  %v137_v45 = vpop.permute.xlu0 %136  ;;  %v150_v24 = vmul.f32 %v788_v41, %v796_v47 }
  0x7f   :  { %v155_v46 = vmul.f32 %v788_v41, %v137_v45  ;;  %163 = vperm.xlu1 %631, %v44_v42   ;;  %v332_v48 = vmul.f32 %v793_v43, %v314_v44 }
  0x81   :  { %v251_v49 = vadd.f32 %v234_v37, %v155_v46 }
  0x83   :  { %v348_v51 = vadd.f32 %v332_v48, %v251_v49 }
  0x84   :  { %454 = vperm.xlu0 %628, %v392_v50   ;;  %634 = vset.pattern.permute.xlu2 %v637_v1 }
  0x85   :  { %v364_v52 = vmax.f32 %v348_v51, 0.0 }
  0x86   :  { %v132_v53 = vpop.permute.xlu0 %131  ;;  %v298_v59 = vpop.permute.xlu2 %297 }
  0x87   :  { %v154_v55 = vmul.f32 %v788_v41, %v132_v53  ;;  %633 = vset.pattern.permute.xlu1 %v636_v0  ;;  %v122_v56 = vpop.permute.xlu1 %121  ;;  %477 = vmatpush.msra.mxu0 %v364_v52  ;;  %v328_v18 = vmul.f32 %v793_v43, %v298_v59 }
  0x88   :  { %590 = vmatpush.msra.mxu2 %v364_v52  ;;  %591 = vmatpush.msra.mxu3 %v364_v52  ;;  %v152_v9 = vmul.f32 %v788_v41, %v122_v56 }
  0x89   :  { %v250_v57 = vadd.f32 %v229_v30, %v154_v55  ;;  %253 = vperm.xlu1 %633, %v27_v31  }
  0x8b   :  { %v347_v60 = vadd.f32 %v331_v54, %v250_v57 }
  0x8c   :  { %439 = vperm.xlu0 %628, %v389_v58  }
  0x8d   :  { %v363_v62 = vmax.f32 %v347_v60, 0.0 }
  0x8e   :  { %v219_v63 = vpop.permute.xlu0 %218  ;;  %v294_v6 = vpop.permute.xlu2 %293 }
  0x8f   :  { %478 = vmatpush.msra.mxu0 %v363_v62  ;;  %592 = vmatpush.msra.mxu2 %v363_v62  ;;  %v248_v11 = vadd.f32 %v219_v63, %v152_v9  ;;  %v327_v25 = vmul.f32 %v793_v43, %v294_v6 }
  0x90   :  { %593 = vmatpush.msra.mxu3 %v363_v62  ;;  %v306_v0 = vpop.permute.xlu1 %305 }
  0x91   :  { %v330_v3 = vmul.f32 %v793_v43, %v306_v0  ;;  %635 = vset.pattern.permute.xlu1 %v637_v1 }
  0x93   :  { %v346_v5 = vadd.f32 %v330_v3, %v249_v2 }
  0x94   :  { %424 = vperm.xlu0 %628, %v386_v4  }
  0x95   :  { %v362_v7 = vmax.f32 %v346_v5, 0.0 }
  0x96   :  { %v107_v8 = vpop.permute.xlu0 %106  ;;  %v290_v15 = vpop.permute.xlu2 %289 }
  0x97   :  { %479 = vmatpush.msra.mxu0 %v362_v7  ;;  %594 = vmatpush.msra.mxu2 %v362_v7  ;;  %v149_v32 = vmul.f32 %v788_v41, %v107_v8  ;;  %v326_v34 = vmul.f32 %v793_v43, %v290_v15 }
  0x98   :  { %595 = vmatpush.msra.mxu3 %v362_v7  ;;  %v302_v10 = vpop.permute.xlu1 %301 }
  0x99   :  { %v329_v12 = vmul.f32 %v793_v43, %v302_v10 }
  0x9b   :  { %v345_v14 = vadd.f32 %v329_v12, %v248_v11 }
  0x9c   :  { %409 = vperm.xlu0 %628, %v383_v13  }
  0x9d   :  { %v361_v1 = vmax.f32 %v345_v14, 0.0 }
  0x9e   :  { %v102_v16 = vpop.permute.xlu0 %101  ;;  %v286_v26 = vpop.permute.xlu2 %285 }
  0x9f   :  { %480 = vmatpush.msra.mxu0 %v361_v1  ;;  %596 = vmatpush.msra.mxu2 %v361_v1  ;;  %v148_v40 = vmul.f32 %v788_v41, %v102_v16  ;;  %v325_v44 = vmul.f32 %v793_v43, %v286_v26 }
  0xa0   :  { %597 = vmatpush.msra.mxu3 %v361_v1 }
  0xa1   :  { %v214_v19 = vpop.permute.xlu1 %213 }
  0xa2   :  { %v247_v21 = vadd.f32 %v214_v19, %v151_v17 }
  0xa4   :  { %v344_v22 = vadd.f32 %v328_v18, %v247_v21  ;;  %562 = vperm.xlu0 %628, %v559_v20  }
  0xa6   :  { %v360_v23 = vmax.f32 %v344_v22, 0.0  ;;  %v97_v27 = vpop.permute.xlu0 %96  ;;  %v282_v35 = vpop.permute.xlu2 %281 }
  0xa7   :  { %v147_v50 = vmul.f32 %v788_v41, %v97_v27  ;;  %v324_v52 = vmul.f32 %v793_v43, %v282_v35 }
  0xa8   :  { %481 = vmatpush.msra.mxu0 %v360_v23  ;;  %598 = vmatpush.msra.mxu2 %v360_v23 }
  0xa9   :  { %599 = vmatpush.msra.mxu3 %v360_v23  ;;  %v209_v28 = vpop.permute.xlu1 %208 }
  0xaa   :  { %v246_v29 = vadd.f32 %v209_v28, %v150_v24 }
  0xac   :  { %v343_v30 = vadd.f32 %v327_v25, %v246_v29 }
  0xae   :  { %v359_v31 = vmax.f32 %v343_v30, 0.0  ;;  %v92_v37 = vpop.permute.xlu0 %91  ;;  %v278_v46 = vpop.permute.xlu2 %277 }
  0xaf   :  { %v146_v58 = vmul.f32 %v788_v41, %v92_v37  ;;  %v323_v60 = vmul.f32 %v793_v43, %v278_v46  ;;  %v394_v37 = vld [vmem:[%s939_s4 + $0x68] sm:$0xff]  ;;  %v396_v46 = vld [vmem:[%s939_s4 + $0x78] sm:$0xff] }
  0xb0   :  { %482 = vmatpush.msra.mxu0 %v359_v31  ;;  %600 = vmatpush.msra.mxu2 %v359_v31 }
  0xb1   :  { %601 = vmatpush.msra.mxu3 %v359_v31  ;;  %v204_v33 = vpop.permute.xlu1 %203  ;;  %464 = vperm.xlu1 %635, %v394_v37  }
  0xb2   :  { %v245_v36 = vadd.f32 %v204_v33, %v149_v32  ;;  %474 = vperm.xlu2 %634, %v396_v46  }
  0xb4   :  { %v342_v38 = vadd.f32 %v326_v34, %v245_v36 }
  0xb6   :  { %v358_v39 = vmax.f32 %v342_v38, 0.0  ;;  %v87_v48 = vpop.permute.xlu0 %86  ;;  %v274_v55 = vpop.permute.xlu2 %273 }
  0xb7   :  { %v145_v0 = vmul.f32 %v788_v41, %v87_v48  ;;  %v322_v5 = vmul.f32 %v793_v43, %v274_v55  ;;  %v375_v55 = vld [vmem:[%s941_s3 + $0x50] sm:$0xff] }
  0xb8   :  { %483 = vmatpush.msra.mxu0 %v358_v39  ;;  %602 = vmatpush.msra.mxu2 %v358_v39 }
  0xb9   :  { %603 = vmatpush.msra.mxu3 %v358_v39  ;;  %v199_v42 = vpop.permute.xlu1 %198 }
  0xba   :  { %v244_v45 = vadd.f32 %v199_v42, %v148_v40 }
  0xbc   :  { %v341_v47 = vadd.f32 %v325_v44, %v244_v45 }
  0xbe   :  { %v357_v49 = vmax.f32 %v341_v47, 0.0  ;;  %v82_v57 = vpop.permute.xlu0 %81  ;;  %v270_v2 = vpop.permute.xlu2 %269  ;;  %v391_v47 = vld [vmem:[%s939_s4 + $0x50] sm:$0xff] }
  0xbf   :  { %v144_v9 = vmul.f32 %v788_v41, %v82_v57  ;;  %v321_v11 = vmul.f32 %v793_v43, %v270_v2  ;;  %449 = vperm.xlu1 %635, %v391_v47   ;;  %v385_v57 = vld [vmem:[%s939_s4 + $0x20] sm:$0xff] }
  0xc0   :  { %484 = vmatpush.msra.mxu0 %v357_v49  ;;  %604 = vmatpush.msra.mxu2 %v357_v49  ;;  %v377_v2 = vld [vmem:[%s941_s3 + $0x60] sm:$0xff] }
  0xc1   :  { %605 = vmatpush.msra.mxu3 %v357_v49  ;;  %v194_v51 = vpop.permute.xlu1 %193 }
  0xc2   :  { %v243_v53 = vadd.f32 %v194_v51, %v147_v50  ;;  %v374_v50 = vld [vmem:[%s941_s3 + $0x48] sm:$0xff]  ;;  %v393_v51 = vld [vmem:[%s939_s4 + $0x60] sm:$0xff] }
  0xc3   :  { %459 = vperm.xlu2 %634, %v393_v51  }
  0xc4   :  { %v340_v54 = vadd.f32 %v324_v52, %v243_v53  ;;  %v388_v52 = vld [vmem:[%s939_s4 + $0x38] sm:$0xff]  ;;  %v366_v53 = vld [vmem:[%s941_s3 + $0x8] sm:$0xff] }
  0xc6   :  { %v356_v56 = vmax.f32 %v340_v54, 0.0  ;;  %v77_v3 = vpop.permute.xlu0 %76  ;;  %v266_v13 = vpop.permute.xlu2 %265  ;;  %v370_v54 = vld [vmem:[%s941_s3 + $0x28] sm:$0xff] }
  0xc7   :  { %v143_v16 = vmul.f32 %v788_v41, %v77_v3  ;;  %v320_v18 = vmul.f32 %v793_v43, %v266_v13  ;;  %434 = vperm.xlu1 %635, %v388_v52   ;;  %v384_v3 = vld [vmem:[%s939_s4 + $0x18] sm:$0xff] }
  0xc8   :  { %485 = vmatpush.msra.mxu0 %v356_v56  ;;  %606 = vmatpush.msra.mxu2 %v356_v56 }
  0xc9   :  { %607 = vmatpush.msra.mxu3 %v356_v56  ;;  %v189_v59 = vpop.permute.xlu1 %188  ;;  %v390_v56 = vld [vmem:[%s939_s4 + $0x48] sm:$0xff] }
  0xca   :  { %v242_v61 = vadd.f32 %v189_v59, %v146_v58  ;;  %v367_v58 = vld [vmem:[%s941_s3 + $0x10] sm:$0xff] }
  0xcb   :  { %444 = vperm.xlu2 %634, %v390_v56   ;;  %v371_v59 = vld [vmem:[%s941_s3 + $0x30] sm:$0xff] }
  0xcc   :  { %v339_v62 = vadd.f32 %v323_v60, %v242_v61  ;;  %v376_v60 = vld [vmem:[%s941_s3 + $0x58] sm:$0xff]  ;;  %v382_v61 = vld [vmem:[%s939_s4 + $0x8] sm:$0xff] }
  0xce   :  { %v355_v63 = vmax.f32 %v339_v62, 0.0  ;;  %v72_v14 = vpop.permute.xlu0 %71  ;;  %v262_v21 = vpop.permute.xlu2 %261  ;;  %v387_v62 = vld [vmem:[%s939_s4 + $0x30] sm:$0xff] }
  0xcf   :  { %v142_v24 = vmul.f32 %v788_v41, %v72_v14  ;;  %v319_v26 = vmul.f32 %v793_v43, %v262_v21  ;;  %419 = vperm.xlu1 %635, %v385_v57  }
  0xd0   :  { %486 = vmatpush.msra.mxu0 %v355_v63  ;;  %608 = vmatpush.msra.mxu2 %v355_v63 }
  0xd1   :  { %609 = vmatpush.msra.mxu3 %v355_v63  ;;  %v184_v4 = vpop.permute.xlu1 %183  ;;  %v368_v63 = vld [vmem:[%s941_s3 + $0x18] sm:$0xff] }
  0xd2   :  { %v241_v6 = vadd.f32 %v184_v4, %v145_v0  ;;  %v372_v0 = vld [vmem:[%s941_s3 + $0x38] sm:$0xff]  ;;  %v373_v4 = vld [vmem:[%s941_s3 + $0x40] sm:$0xff] }
  0xd3   :  { %429 = vperm.xlu2 %634, %v387_v62  }
  0xd4   :  { %v338_v7 = vadd.f32 %v322_v5, %v241_v6  ;;  %v378_v5 = vld [vmem:[%s941_s3 + $0x68] sm:$0xff]  ;;  %v381_v6 = vld [vmem:[%s939_s4] sm:$0xff] }
  0xd6   :  { %v354_v8 = vmax.f32 %v338_v7, 0.0  ;;  %v67_v22 = vpop.permute.xlu0 %66  ;;  %v258_v30 = vpop.permute.xlu2 %257  ;;  %v379_v7 = vld [vmem:[%s941_s3 + $0x70] sm:$0xff] }
  0xd7   :  { %v141_v32 = vmul.f32 %v788_v41, %v67_v22  ;;  %v318_v34 = vmul.f32 %v793_v43, %v258_v30  ;;  %404 = vperm.xlu1 %635, %v382_v61  }
  0xd8   :  { %487 = vmatpush.msra.mxu0 %v354_v8  ;;  %610 = vmatpush.msra.mxu2 %v354_v8 }
  0xd9   :  { %611 = vmatpush.msra.mxu3 %v354_v8  ;;  %v179_v10 = vpop.permute.xlu1 %178  ;;  %v380_v8 = vld [vmem:[%s941_s3 + $0x78] sm:$0xff] }
  0xda   :  { %v240_v12 = vadd.f32 %v179_v10, %v144_v9 }
  0xdb   :  { %414 = vperm.xlu2 %634, %v384_v3  }
  0xdc   :  { %v337_v1 = vadd.f32 %v321_v11, %v240_v12 }
  0xde   :  { %v353_v15 = vmax.f32 %v337_v1, 0.0  ;;  %v62_v31 = vpop.permute.xlu0 %61 }
  0xdf   :  { %v140_v40 = vmul.f32 %v788_v41, %v62_v31  ;;  %v365_v41 = vld [vmem:[%s941_s3] sm:$0xff] }
  0xe0   :  { %488 = vmatpush.msra.mxu0 %v353_v15  ;;  %612 = vmatpush.msra.mxu2 %v353_v15 }
  0xe1   :  { %613 = vmatpush.msra.mxu3 %v353_v15  ;;  %v174_v17 = vpop.permute.xlu1 %173 }
  0xe2   :  { %v239_v19 = vadd.f32 %v174_v17, %v143_v16 }
  0xe3   :  { %399 = vperm.xlu2 %634, %v381_v6  }
  0xe4   :  { %v336_v20 = vadd.f32 %v320_v18, %v239_v19 }
  0xe6   :  { %v352_v23 = vmax.f32 %v336_v20, 0.0  ;;  %v159_v39 = vpop.permute.xlu0 %158 }
  0xe7   :  { %v236_v44 = vadd.f32 %v159_v39, %v140_v40 }
  0xe8   :  { %489 = vmatpush.msra.mxu0 %v352_v23  ;;  %614 = vmatpush.msra.mxu2 %v352_v23 }
  0xe9   :  { %615 = vmatpush.msra.mxu3 %v352_v23  ;;  %v169_v25 = vpop.permute.xlu1 %168 }
  0xea   :  { %v238_v27 = vadd.f32 %v169_v25, %v142_v24 }
  0xec   :  { %v335_v28 = vadd.f32 %v319_v26, %v238_v27 }
  0xee   :  { %v351_v29 = vmax.f32 %v335_v28, 0.0  ;;  %v470_v15 = vpop.permute.xlu0 %469 }
  0xf0   :  { %490 = vmatpush.msra.mxu0 %v351_v29  ;;  %616 = vmatpush.msra.mxu2 %v351_v29 }
  0xf1   :  { %617 = vmatpush.msra.mxu3 %v351_v29  ;;  %v164_v33 = vpop.permute.xlu1 %163 }
  0xf2   :  { %v237_v35 = vadd.f32 %v164_v33, %v141_v32 }
  0xf4   :  { %v334_v36 = vadd.f32 %v318_v34, %v237_v35 }
  0xf6   :  { %v350_v38 = vmax.f32 %v334_v36, 0.0  ;;  %v455_v22 = vpop.permute.xlu0 %454 }
  0xf8   :  { %491 = vmatpush.msra.mxu0 %v350_v38  ;;  %618 = vmatpush.msra.mxu2 %v350_v38 }
  0xf9   :  { %619 = vmatpush.msra.mxu3 %v350_v38 }
  0xfb   :  { %v254_v42 = vpop.permute.xlu1 %253 }
  0xfc   :  { %v317_v45 = vmul.f32 %v793_v43, %v254_v42  ;;  %v369_v43 = vld [vmem:[%s941_s3 + $0x20] sm:$0xff] }
  0xfe   :  { %v333_v48 = vadd.f32 %v317_v45, %v236_v44  ;;  %v440_v32 = vpop.permute.xlu0 %439 }
 0x100   :  { %v349_v49 = vmax.f32 %v333_v48, 0.0 }
 0x102   :  { %492 = vmatpush.msra.mxu0 %v349_v49  ;;  %620 = vmatpush.msra.mxu2 %v349_v49 }
 0x103   :  { %621 = vmatpush.msra.mxu3 %v349_v49  ;;  %493 = vmatmul.f32.vlgmr.msra.gmra.mxu0 %v365_v41 }
 0x104   :  { %505 = vmatmul.f32.vlgmr.msra.gmra.mxu2 %v369_v43  ;;  %520 = vmatmul.f32.vlgmr.msra.gmra.mxu3 %v374_v50 }
 0x106   :  { %v425_v49 = vpop.permute.xlu0 %424 }
 0x10b   :  { %496 = vmatmul.f32.gmra.mxu0 %v366_v53 }
 0x10c   :  { %508 = vmatmul.f32.gmra.mxu2 %v370_v54  ;;  %523 = vmatmul.f32.gmra.mxu3 %v375_v55  ;;  %v475_v14 = vpop.permute.xlu2 %474 }
 0x10e   :  { %v410_v61 = vpop.permute.xlu0 %409 }
 0x113   :  { %499 = vmatmul.f32.gmra.mxu0 %v367_v58 }
 0x114   :  { %511 = vmatmul.f32.gmra.mxu2 %v371_v59  ;;  %526 = vmatmul.f32.gmra.mxu3 %v376_v60 }
 0x11b   :  { %502 = vmatmul.f32.gmra.mxu0 %v368_v63 }
 0x11c   :  { %514 = vmatmul.f32.gmra.mxu2 %v372_v0  ;;  %529 = vmatmul.f32.gmra.mxu3 %v377_v2 }
 0x11d   :  { %v460_v17 = vpop.permute.xlu2 %459 }
 0x123   :  { %v465_v18 = vpop.permute.xlu1 %464 }
 0x124   :  { %517 = vmatmul.f32.gmra.mxu2 %v373_v4  ;;  %532 = vmatmul.f32.gmra.mxu3 %v378_v5 }
 0x125   :  { %v445_v23 = vpop.permute.xlu2 %444 }
 0x12c   :  { %535 = vmatmul.f32.gmra.mxu3 %v379_v7 }
 0x12d   :  { %v430_v35 = vpop.permute.xlu2 %429 }
 0x131   :  { %v450_v24 = vpop.permute.xlu1 %449 }
 0x134   :  { %538 = vmatmul.f32.gmra.mxu3 %v380_v8 }
 0x135   :  { %v415_v50 = vpop.permute.xlu2 %414 }
 0x139   :  { %v435_v36 = vpop.permute.xlu1 %434 }
 0x13d   :  { %v400_v2 = vpop.permute.xlu2 %399 }
 0x141   :  { %v420_v51 = vpop.permute.xlu1 %419 }
 0x149   :  { %v405_v62 = vpop.permute.xlu1 %404 }
 0x180   :  { %v494_v20 = vpop.f32.mrf.mxu0 }
 0x181   :  { %v495_v6 = vadd.f32 %v494_v20, %v400_v2 }
 0x183   :  { %v542_v8 = vmax.f32 %v495_v6, 0.0 }
 0x187   :  { %v521_v9 = vpop.f32.mrf.mxu3  ;;  %v506_v12 = vpop.f32.mrf.mxu2 }
 0x188   :  { %v497_v29 = vpop.f32.mrf.mxu0  ;;  %v522_v44 = vadd.f32 %v521_v9, %v445_v23  ;;  %v507_v58 = vadd.f32 %v506_v12, %v420_v51  ;;  %v558_v9 = vld [vmem:[%s942_s5] sm:$0x3] }
 0x189   :  { %v498_v4 = vadd.f32 %v497_v29, %v405_v62 }
 0x18a   :  { %v551_v41 = vmax.f32 %v522_v44, 0.0  ;;  %v546_v0 = vmax.f32 %v507_v58, 0.0 }
 0x18b   :  { %v543_v7 = vmax.f32 %v498_v4, 0.0 }
 0x18f   :  { %v524_v10 = vpop.f32.mrf.mxu3  ;;  %v509_v1 = vpop.f32.mrf.mxu2 }
 0x190   :  { %v525_v39 = vadd.f32 %v524_v10, %v450_v24  ;;  %v500_v46 = vpop.f32.mrf.mxu0  ;;  %v510_v54 = vadd.f32 %v509_v1, %v425_v49  ;;  %v563_v10 = vpop.permute.xlu0 %562 }
 0x191   :  { %v501_v63 = vadd.f32 %v500_v46, %v410_v61 }
 0x192   :  { %v552_v47 = vmax.f32 %v525_v39, 0.0  ;;  %v547_v59 = vmax.f32 %v510_v54, 0.0 }
 0x193   :  { %v544_v5 = vmax.f32 %v501_v63, 0.0 }
 0x197   :  { %v527_v11 = vpop.f32.mrf.mxu3  ;;  %v512_v19 = vpop.f32.mrf.mxu2 }
 0x198   :  { %v528_v37 = vadd.f32 %v527_v11, %v455_v22  ;;  %v513_v52 = vadd.f32 %v512_v19, %v430_v35  ;;  %v503_v56 = vpop.f32.mrf.mxu0 }
 0x199   :  { %v504_v60 = vadd.f32 %v503_v56, %v415_v50 }
 0x19a   :  { %v553_v45 = vmax.f32 %v528_v37, 0.0  ;;  %v548_v57 = vmax.f32 %v513_v52, 0.0 }
 0x19b   :  { %v545_v3 = vmax.f32 %v504_v60, 0.0 }
 0x19f   :  { %v530_v13 = vpop.f32.mrf.mxu3  ;;  %v515_v25 = vpop.f32.mrf.mxu2 }
 0x1a0   :  { %v531_v33 = vadd.f32 %v530_v13, %v460_v17  ;;  %v516_v43 = vadd.f32 %v515_v25, %v435_v36 }
 0x1a2   :  { %v554_v40 = vmax.f32 %v531_v33, 0.0  ;;  %v549_v55 = vmax.f32 %v516_v43, 0.0 }
 0x1a7   :  { %v533_v16 = vpop.f32.mrf.mxu3  ;;  %v518_v42 = vpop.f32.mrf.mxu2 }
 0x1a8   :  { %v534_v30 = vadd.f32 %v533_v16, %v465_v18  ;;  %v519_v48 = vadd.f32 %v518_v42, %v440_v32 }
 0x1aa   :  { %v555_v38 = vmax.f32 %v534_v30, 0.0  ;;  %v550_v53 = vmax.f32 %v519_v48, 0.0 }
 0x1af   :  { %v536_v21 = vpop.f32.mrf.mxu3 }
 0x1b0   :  { %v537_v27 = vadd.f32 %v536_v21, %v470_v15 }
 0x1b2   :  { %v556_v34 = vmax.f32 %v537_v27, 0.0 }
 0x1b7   :  { %v539_v26 = vpop.f32.mrf.mxu3 }
 0x1b8   :  { %v540_v28 = vadd.f32 %v539_v26, %v475_v14 }
 0x1ba   :  { %v557_v31 = vmax.f32 %v540_v28, 0.0 }
 0x1bc   :  { %565 = vmatpush.msra.mxu1 %v557_v31 }
 0x1be   :  { %566 = vmatpush.msra.mxu1 %v556_v34 }
 0x1c0   :  { %567 = vmatpush.msra.mxu1 %v555_v38 }
 0x1c2   :  { %568 = vmatpush.msra.mxu1 %v554_v40 }
 0x1c4   :  { %569 = vmatpush.msra.mxu1 %v553_v45 }
 0x1c6   :  { %570 = vmatpush.msra.mxu1 %v552_v47 }
 0x1c8   :  { %571 = vmatpush.msra.mxu1 %v551_v41 }
 0x1ca   :  { %572 = vmatpush.msra.mxu1 %v550_v53 }
 0x1cc   :  { %573 = vmatpush.msra.mxu1 %v549_v55 }
 0x1ce   :  { %574 = vmatpush.msra.mxu1 %v548_v57 }
 0x1d0   :  { %575 = vmatpush.msra.mxu1 %v547_v59 }
 0x1d2   :  { %576 = vmatpush.msra.mxu1 %v546_v0 }
 0x1d4   :  { %577 = vmatpush.msra.mxu1 %v545_v3 }
 0x1d6   :  { %578 = vmatpush.msra.mxu1 %v544_v5 }
 0x1d8   :  { %579 = vmatpush.msra.mxu1 %v543_v7 }
 0x1da   :  { %580 = vmatpush.msra.mxu1 %v542_v8 }
 0x1db   :  { %581 = vmatmul.f32.vlgmr.msra.gmra.mxu1 %v558_v9 }
 0x258   :  { %v582_v11 = vpop.f32.mrf.mxu1 }
 0x259   :  { %v583_v12 = vadd.f32 %v582_v11, %v563_v10 }
 0x25b   :  { %585 = vst [vmem:[%s943_s7] sm:$0x3] %v583_v12 }

</bundles_post_ra>
